<compile_context>
chip_gen: v7x
topology: tpu7x:2x2x1
jax: 0.10.0
libtpu: 0.0.40
codegen_flags: <defaults>
</compile_context>

<pallas_src>
import functools

import jax
import jax.numpy as jnp
from jax.experimental import pallas as pl
from jax.experimental.pallas import tpu as pltpu


LANE = 128          # TPU lane width; batch tiles are multiples of this.
BM_CAP = 8192       # keeps VMEM footprint well inside the raised limit on v7x.


def _round_up(x, m):
    return ((x + m - 1) // m) * m


# ---------------------------------------------------------------------------
# Pallas kernel: one batch tile of the propagate MLP, batch on lanes.
# ---------------------------------------------------------------------------
def _propagate_kernel(t_ref, x_ref, w1x_ref, w1t_ref, b1_ref, w2_ref, b2_ref,
                      out_ref):
    # t_ref  : (1, bm)    time row, batch along lanes
    # x_ref  : (bm, dim)  raw x block straight from HBM (batch on sublanes)
    # w1x_ref: (H, dim)   W1[:, 1:]  (resident across grid steps)
    # w1t_ref: (H, 1)     W1[:, :1]  (t column of the first Linear)
    # b1_ref : (H, 1)     first Linear bias (broadcast across lanes)
    # w2_ref : (1, H)     second Linear weight
    # b2_ref : (1, 1)     second Linear bias, SMEM scalar
    # out_ref: (1, bm)    phi(t, x) for this tile -- lane-dense store
    #
    # h[i, b] = sum_d W1[i, d+1] * x[b, d] + W1[i, 0] * t[b] + b1[i]
    xw = jax.lax.dot_general(
        w1x_ref[...], x_ref[...],
        dimension_numbers=(((1,), (1,)), ((), ())),   # NT: contract the dim axes
        preferred_element_type=jnp.float32)           # (H, bm), batch on lanes
    h = xw + w1t_ref[...] * t_ref[...] + b1_ref[...]  # rank-1 t term + bias (VPU)
    # nn.Sigmoid as a single EUP op (tanh), no divide: sigmoid(x)=0.5*tanh(x/2)+0.5
    h = 0.5 * jnp.tanh(0.5 * h) + 0.5
    out = jnp.dot(w2_ref[...], h, preferred_element_type=jnp.float32)  # (1, bm)
    out_ref[...] = (out + b2_ref[0, 0]).astype(out_ref.dtype)


# ---------------------------------------------------------------------------
# One-time parameter prep (PyTorch nn.Linear layouts -> kernel layouts).
# ---------------------------------------------------------------------------
def prepare_params(w1, b1, w2, b2):
    """w1: (H, 1+dim), b1: (H,), w2: (1, H), b2: (1,)  (PyTorch nn.Linear)."""
    w1 = jnp.asarray(w1, jnp.float32)
    H = w1.shape[0]
    return (w1[:, 1:],                                   # (H, dim)  x part of W1
            w1[:, :1],                                   # (H, 1)    t column of W1
            jnp.asarray(b1, jnp.float32).reshape(H, 1),  # (H, 1)
            jnp.asarray(w2, jnp.float32),                # (1, H)
            jnp.asarray(b2, jnp.float32).reshape(1, 1))  # (1, 1) SMEM scalar


# ---------------------------------------------------------------------------
# Wrapper: TrajCD.forward (batched branch).
# ---------------------------------------------------------------------------
@functools.partial(jax.jit, static_argnames=("bm", "r_all"))
def trajcd_forward(t_in, x_in, w1x, w1t, b1_col, w2, b2_s, *, bm=4096,
                   r_all=False):
    """t_in: (B,) f32; x_in: (B, dim) f32; params from prepare_params().

    Returns phi_tx: (B, 1) (and enc_x == x_in if r_all).  Any B is supported:
    boundary tiles rely on Pallas' out-of-bounds block handling (per-batch-lane
    independent math, invalid lanes never written back), so no padding copies.
    """
    B, dim = x_in.shape
    H = w1x.shape[0]

    # --- static tile sizing --------------------------------------------------
    bm = min(max(LANE, (bm // LANE) * LANE), BM_CAP)   # lane multiple, VMEM-capped
    b_lane = _round_up(B, LANE)
    n_tiles = -(-b_lane // bm)
    if n_tiles < 2 and b_lane >= 2 * LANE:
        n_tiles = 2                                    # give both v7x TCs work
    bm_eff = _round_up(-(-b_lane // n_tiles), LANE)
    n_tiles = -(-b_lane // bm_eff)

    # Free reshapes only -- no HBM relayout / concat / pad in the wrapper.
    t_row = t_in.reshape(1, B).astype(jnp.float32)     # (1, B), batch on lanes
    x_f32 = x_in.astype(jnp.float32)                   # (B, dim), read as-is

    phi_row = pl.pallas_call(
        _propagate_kernel,
        out_shape=jax.ShapeDtypeStruct((1, B), jnp.float32),
        grid=(n_tiles,),
        in_specs=[
            # streamed per grid step (only per-step HBM traffic)
            pl.BlockSpec((1, bm_eff), lambda i: (0, i)),        # t row
            pl.BlockSpec((bm_eff, dim), lambda i: (i, 0)),      # x block, raw
            # weights / bias: constant index_map -> resident across steps
            pl.BlockSpec((H, dim), lambda i: (0, 0)),           # W1[:, 1:]
            pl.BlockSpec((H, 1), lambda i: (0, 0)),             # W1[:, :1]
            pl.BlockSpec((H, 1), lambda i: (0, 0)),             # b1
            pl.BlockSpec((1, H), lambda i: (0, 0)),             # W2
            # b2 as a scalar in SMEM (avoids a padded VMEM tile + DMA stream)
            pl.BlockSpec(memory_space=pltpu.MemorySpace.SMEM),
        ],
        out_specs=pl.BlockSpec((1, bm_eff), lambda i: (0, i)),  # lane-dense
        compiler_params=pltpu.CompilerParams(
            dimension_semantics=("parallel",),
            vmem_limit_bytes=48 * 1024 * 1024),
    )(t_row, x_f32, w1x, w1t, b1_col, w2, b2_s)

    phi = phi_row.reshape(B, 1)
    if r_all:
        return phi, x_in        # enc_x = x_in in the reference forward
    return phi


# ---------------------------------------------------------------------------
# Pure-JAX reference (correctness check only; mirrors the PyTorch forward).
# ---------------------------------------------------------------------------
def _reference_forward(t_in, x_in, w1, b1, w2, b2):
    tx = jnp.concatenate([t_in.reshape(-1, 1), x_in], axis=1)
    h = jax.nn.sigmoid(tx @ w1.T + b1)
    return h @ w2.T + b2


# TODO(synk): the t_in.numel() == 1 branch (un-batched 1-D concat) and the unused
# `encode` Linear / training machinery are not exercised by the hot path and are
# left out of the kernel.

if __name__ == "__main__":
    key = jax.random.PRNGKey(0)
    B, dim, H = 16, 4, 150            # batch, meta_dat['dim'], hidden width

    k_t, k_x, k_w1, k_b1, k_w2, k_b2 = jax.random.split(key, 6)

    def bf16_exact(a):
        # Round test data to bf16-representable f32 values so the comparison is
        # insensitive to whether f32 matmuls run as bf16 MXU passes
        # (Precision.DEFAULT on TPU) or as full-precision f32 on either side.
        return jnp.asarray(a, jnp.bfloat16).astype(jnp.float32)

    # Inputs: time points and initial conditions / coefficients.
    t_in = bf16_exact(jax.random.uniform(k_t, (B,), jnp.float32) * 10.0)
    x_in = bf16_exact(jax.random.normal(k_x, (B, dim), jnp.float32))

    # Deterministic parameter init, matching nn.Linear fan-in uniform bounds.
    fan1 = 1 + dim
    lim1 = 1.0 / (fan1 ** 0.5)
    w1 = bf16_exact(jax.random.uniform(k_w1, (H, fan1), jnp.float32, -lim1, lim1))
    b1 = bf16_exact(jax.random.uniform(k_b1, (H,), jnp.float32, -lim1, lim1))
    lim2 = 1.0 / (H ** 0.5)
    w2 = bf16_exact(jax.random.uniform(k_w2, (1, H), jnp.float32, -lim2, lim2))
    b2 = bf16_exact(jax.random.uniform(k_b2, (1,), jnp.float32, -lim2, lim2))

    params = prepare_params(w1, b1, w2, b2)   # one-time layout prep

    # Tolerance: typical agreement is ~1e-6; 1e-3 only guards the case where the
    # final (1,H)x(H,B) dot is executed at bf16 MXU precision on one side.
    ATOL = RTOL = 1e-3

    # --- main check: small batch, single grid step, r_all=True --------------
    phi, enc_x = trajcd_forward(t_in, x_in, *params, r_all=True)
    phi = jax.block_until_ready(phi)
    ref = _reference_forward(t_in, x_in, w1, b1, w2, b2)
    assert phi.shape == (B, 1)
    assert enc_x.shape == (B, dim)
    assert jnp.allclose(phi, ref, atol=ATOL, rtol=RTOL), (
        f"max err {jnp.max(jnp.abs(phi - ref))}")

    # --- ragged batch, default bm -> 2 tiles of 256 lanes (2-core split) ----
    B2 = 300
    k_t2, k_x2 = jax.random.split(jax.random.PRNGKey(1), 2)
    t2 = bf16_exact(jax.random.uniform(k_t2, (B2,), jnp.float32) * 10.0)
    x2 = bf16_exact(jax.random.normal(k_x2, (B2, dim), jnp.float32))
    phi2 = jax.block_until_ready(trajcd_forward(t2, x2, *params))
    ref2 = _reference_forward(t2, x2, w1, b1, w2, b2)
    assert phi2.shape == (B2, 1)
    assert jnp.allclose(phi2, ref2, atol=ATOL, rtol=RTOL), (
        f"max err {jnp.max(jnp.abs(phi2 - ref2))}")

    # --- explicit small tile (bm=128 -> 3-step streaming grid) --------------
    phi3 = jax.block_until_ready(trajcd_forward(t2, x2, *params, bm=128))
    assert jnp.allclose(phi3, ref2, atol=ATOL, rtol=RTOL), (
        f"max err {jnp.max(jnp.abs(phi3 - ref2))}")

    print("KERNEL_OK")
</pallas_src>

<mosaic_0001>
module attributes {stable_mosaic.version = 11 : i64} {
  func.func @_propagate_kernel(%arg0: i32, %arg1: memref<1x128xf32, #tpu.memory_space<vmem>>, %arg2: memref<128x4xf32, #tpu.memory_space<vmem>>, %arg3: memref<150x4xf32, #tpu.memory_space<vmem>>, %arg4: memref<150x1xf32, #tpu.memory_space<vmem>>, %arg5: memref<150x1xf32, #tpu.memory_space<vmem>>, %arg6: memref<1x150xf32, #tpu.memory_space<vmem>>, %arg7: memref<1x1xf32, #tpu.memory_space<smem>>, %arg8: memref<1x128xf32, #tpu.memory_space<vmem>>) attributes {dimension_semantics = [#tpu.dimension_semantics<parallel>], iteration_bounds = array<i64: 1>, scalar_prefetch = 0 : i64, scratch_operands = 0 : i64, tpu.core_type = #tpu.core_type<tc>, window_params = [{transform_indices = @transform_0, window_bounds = array<i64: 1, 128>}, {transform_indices = @transform_1, window_bounds = array<i64: 128, 4>}, {pipeline_mode = #tpu.pipeline_mode<synchronous>, transform_indices = @transform_2, window_bounds = array<i64: 150, 4>}, {pipeline_mode = #tpu.pipeline_mode<synchronous>, transform_indices = @transform_3, window_bounds = array<i64: 150, 1>}, {pipeline_mode = #tpu.pipeline_mode<synchronous>, transform_indices = @transform_4, window_bounds = array<i64: 150, 1>}, {pipeline_mode = #tpu.pipeline_mode<synchronous>, transform_indices = @transform_5, window_bounds = array<i64: 1, 150>}, {transform_indices = @transform_6, window_bounds = array<i64: 1, 1>}, {transform_indices = @transform_7, window_bounds = array<i64: 1, 128>}]} {
    %c0 = arith.constant 0 : index
    %c0_0 = arith.constant 0 : index
    %0 = vector.load %arg3[%c0, %c0_0] : memref<150x4xf32, #tpu.memory_space<vmem>>, vector<150x4xf32>
    %c0_1 = arith.constant 0 : index
    %c0_2 = arith.constant 0 : index
    %1 = vector.load %arg2[%c0_1, %c0_2] : memref<128x4xf32, #tpu.memory_space<vmem>>, vector<128x4xf32>
    %cst = arith.constant dense<0.000000e+00> : vector<150x128xf32>
    %2 = tpu.matmul %0, %1, %cst {dimension_numbers = #tpu.dot_dimension_numbers<[1], [1], [0], [0], [0, 0, 1, 0], [], []>} : vector<150x4xf32>, vector<128x4xf32>, vector<150x128xf32> -> vector<150x128xf32>
    %c0_3 = arith.constant 0 : index
    %c0_4 = arith.constant 0 : index
    %3 = vector.load %arg4[%c0_3, %c0_4] : memref<150x1xf32, #tpu.memory_space<vmem>>, vector<150x1xf32>
    %c0_5 = arith.constant 0 : index
    %c0_6 = arith.constant 0 : index
    %4 = vector.load %arg1[%c0_5, %c0_6] : memref<1x128xf32, #tpu.memory_space<vmem>>, vector<1x128xf32>
    %5 = vector.broadcast %3 : vector<150x1xf32> to vector<150x128xf32>
    %6 = vector.broadcast %4 : vector<1x128xf32> to vector<150x128xf32>
    %7 = arith.mulf %5, %6 : vector<150x128xf32>
    %8 = arith.addf %2, %7 : vector<150x128xf32>
    %c0_7 = arith.constant 0 : index
    %c0_8 = arith.constant 0 : index
    %9 = vector.load %arg5[%c0_7, %c0_8] : memref<150x1xf32, #tpu.memory_space<vmem>>, vector<150x1xf32>
    %10 = vector.broadcast %9 : vector<150x1xf32> to vector<150x128xf32>
    %11 = arith.addf %8, %10 : vector<150x128xf32>
    %cst_9 = arith.constant 5.000000e-01 : f32
    %12 = vector.broadcast %cst_9 : f32 to vector<150x128xf32>
    %13 = arith.mulf %12, %11 : vector<150x128xf32>
    %14 = math.tanh %13 : vector<150x128xf32>
    %cst_10 = arith.constant 5.000000e-01 : f32
    %15 = vector.broadcast %cst_10 : f32 to vector<150x128xf32>
    %16 = arith.mulf %15, %14 : vector<150x128xf32>
    %cst_11 = arith.constant 5.000000e-01 : f32
    %17 = vector.broadcast %cst_11 : f32 to vector<150x128xf32>
    %18 = arith.addf %16, %17 : vector<150x128xf32>
    %c0_12 = arith.constant 0 : index
    %c0_13 = arith.constant 0 : index
    %19 = vector.load %arg6[%c0_12, %c0_13] : memref<1x150xf32, #tpu.memory_space<vmem>>, vector<1x150xf32>
    %cst_14 = arith.constant dense<0.000000e+00> : vector<1x128xf32>
    %20 = tpu.matmul %19, %18, %cst_14 {dimension_numbers = #tpu.dot_dimension_numbers<[1], [0], [0], [1], [0, 0, 1, 1], [], []>} : vector<1x150xf32>, vector<150x128xf32>, vector<1x128xf32> -> vector<1x128xf32>
    %c0_15 = arith.constant 0 : index
    %c0_16 = arith.constant 0 : index
    %21 = memref.load %arg7[%c0_15, %c0_16] : memref<1x1xf32, #tpu.memory_space<smem>>
    %22 = vector.broadcast %21 : f32 to vector<1x128xf32>
    %23 = arith.addf %20, %22 : vector<1x128xf32>
    %c0_17 = arith.constant 0 : index
    %c0_18 = arith.constant 0 : index
    %24 = vector.load %arg8[%c0_17, %c0_18] : memref<1x128xf32, #tpu.memory_space<vmem>>, vector<1x128xf32>
    tpu.vector_store %arg8[%c0_17, %c0_18], %23 {strides = array<i32>} : memref<1x128xf32, #tpu.memory_space<vmem>>, vector<1x128xf32>,
    return
  }
  func.func @transform_0(%arg0: i32) -> (i32, i32) {
    %c0_i32 = arith.constant 0 : i32
    %c0_i32_0 = arith.constant 0 : i32
    return %c0_i32, %arg0 : i32, i32
  }
  func.func @transform_1(%arg0: i32) -> (i32, i32) {
    %c0_i32 = arith.constant 0 : i32
    %c0_i32_0 = arith.constant 0 : i32
    return %arg0, %c0_i32 : i32, i32
  }
  func.func @transform_2(%arg0: i32) -> (i32, i32) {
    %c0_i32 = arith.constant 0 : i32
    %c0_i32_0 = arith.constant 0 : i32
    %c0_i32_1 = arith.constant 0 : i32
    return %c0_i32, %c0_i32_0 : i32, i32
  }
  func.func @transform_3(%arg0: i32) -> (i32, i32) {
    %c0_i32 = arith.constant 0 : i32
    %c0_i32_0 = arith.constant 0 : i32
    %c0_i32_1 = arith.constant 0 : i32
    return %c0_i32, %c0_i32_0 : i32, i32
  }
  func.func @transform_4(%arg0: i32) -> (i32, i32) {
    %c0_i32 = arith.constant 0 : i32
    %c0_i32_0 = arith.constant 0 : i32
    %c0_i32_1 = arith.constant 0 : i32
    return %c0_i32, %c0_i32_0 : i32, i32
  }
  func.func @transform_5(%arg0: i32) -> (i32, i32) {
    %c0_i32 = arith.constant 0 : i32
    %c0_i32_0 = arith.constant 0 : i32
    %c0_i32_1 = arith.constant 0 : i32
    return %c0_i32, %c0_i32_0 : i32, i32
  }
  func.func @transform_6(%arg0: i32) -> (i32, i32) {
    %c0_i32 = arith.constant 0 : i32
    %c0_i32_0 = arith.constant 0 : i32
    %c0_i32_1 = arith.constant 0 : i32
    return %c0_i32, %c0_i32_0 : i32, i32
  }
  func.func @transform_7(%arg0: i32) -> (i32, i32) {
    %c0_i32 = arith.constant 0 : i32
    %c0_i32_0 = arith.constant 0 : i32
    return %c0_i32, %arg0 : i32, i32
  }
}

</mosaic_0001>

<bundles_post_ra>
// kernel: trajcd_forward.1
= control target key start
LH: loop header
LB: loop body
LE: loop exit
PB: predicated region body
PF: predicated region fallthrough
CT: control target
= control target key end

     0   :  { %vm203_vm0 = vcmask 31744   ;;  %v1073_v2 = vmov 0.0|0.0   ;;  %vm1074_vm2 = vmmov 0   ;;  %v1075_v5 = vmov 0.0   ;;  %s1500_s0 = inlined_call_operand.vmem [shape: f32[1,16], index: 0, kind: input, shape index: {}]   ;;  %s1501_s1 = inlined_call_operand.vmem [shape: f32[16,4], index: 1, kind: input, shape index: {}]   ;;  %s1502_s2 = inlined_call_operand.vmem [shape: f32[150,4], index: 2, kind: input, shape index: {}]   ;;  %s1503_s3 = inlined_call_operand.vmem [shape: f32[150,1], index: 3, kind: input, shape index: {}]   ;;  %s1504_s4 = inlined_call_operand.vmem [shape: f32[150,1], index: 4, kind: input, shape index: {}]   ;;  %s1505_s5 = inlined_call_operand.vmem [shape: f32[1,150], index: 5, kind: input, shape index: {}]   ;;  %s1506_s6 = inlined_call_operand.<no memory space> [shape: f32[1,1], index: 6, kind: input, shape index: {}]   ;;  %s1507_s7 = inlined_call_operand.hbm [shape: f32[1,16], index: 7, kind: output, shape index: {}]  }
   0x1   :  { %v47_v0 = vld [vmem:[%s1501_s1] sm:$0xff]  ;;  %v48_v1 = vld [vmem:[%s1501_s1 + $0x8] sm:$0xff]  ;;  %945 = vmatprep.subr.bf16.mxu0 %v1073_v2  ;;  %vm1127_vm1 = vmpackc.low %vm203_vm0, %vm203_vm0  ;;  %977 = vmatprep.subr.bf16.mxu1 %v1073_v2  ;;  %v1076_v6 = vmov 0  }
   0x2   :  { %v946_v3 = vpack.c.bf16 %v48_v1, %v47_v0  ;;  %888 = vmatprep.mubr.msk.f32.mxu0 %vm1074_vm2, %v1075_v5  ;;  %1009 = vset.pattern.permute.xlu0 %v1076_v6  ;;  %v49_v7 = vld [vmem:[%s1501_s1 + $0x10] sm:$0xff]  ;;  %v50_v8 = vld [vmem:[%s1501_s1 + $0x18] sm:$0xff]  ;;  %v63_v9 = vld [vmem:[%s1503_s3] sm:$0xff] }
   0x3   :  { %1010 = vset.pattern.permute.xlu1 %v1076_v6  ;;  %v950_v10 = vpack.c.bf16 %v50_v8, %v49_v7  ;;  %85 = vperm.xlu0 %1009, %v63_v9   ;;  %v65_v11 = vld [vmem:[%s1503_s3 + $0x10] sm:$0xff]  ;;  %v64_v12 = vld [vmem:[%s1503_s3 + $0x8] sm:$0xff]  ;;  %v66_v13 = vld [vmem:[%s1503_s3 + $0x18] sm:$0xff] }
   0x4   :  { %948 = vmatpush3.bf16.xpose.msk.msra.mxu0 %vm1127_vm1, %v946_v3  ;;  %95 = vperm.xlu1 %1010, %v65_v11   ;;  %v51_v14 = vld [vmem:[%s1501_s1 + $0x20] sm:$0xff]  ;;  %v52_v15 = vld [vmem:[%s1501_s1 + $0x28] sm:$0xff]  ;;  %v53_v21 = vld [vmem:[%s1501_s1 + $0x30] sm:$0xff] }
   0x5   :  { %949 = vmatprep.subr.bf16.mxu0 %v1073_v2  ;;  %v469_v16 = vld [vmem:[%s1504_s4] sm:$0xff]  ;;  %v470_v17 = vld [vmem:[%s1504_s4 + $0x8] sm:$0xff]  ;;  %v954_v18 = vpack.c.bf16 %v52_v15, %v51_v14  ;;  %v54_v22 = vld [vmem:[%s1501_s1 + $0x38] sm:$0xff] }
   0x6   :  { %v67_v19 = vld [vmem:[%s1503_s3 + $0x20] sm:$0xff]  ;;  %v68_v20 = vld [vmem:[%s1503_s3 + $0x28] sm:$0xff]  ;;  %v471_v23 = vld [vmem:[%s1504_s4 + $0x10] sm:$0xff]  ;;  %v958_v25 = vpack.c.bf16 %v54_v22, %v53_v21 }
   0x7   :  { %90 = vperm.xlu0 %1009, %v64_v12   ;;  %v472_v24 = vld [vmem:[%s1504_s4 + $0x18] sm:$0xff]  ;;  %v69_v26 = vld [vmem:[%s1503_s3 + $0x30] sm:$0xff] }
   0x8   :  { %100 = vperm.xlu1 %1010, %v66_v13   ;;  %v70_v27 = vld [vmem:[%s1503_s3 + $0x38] sm:$0xff] }
   0xb   :  { %490 = vperm.xlu0 %1009, %v469_v16  }
   0xc   :  { %952 = vmatpush3.bf16.xpose.msk.msra.mxu0 %vm1127_vm1, %v950_v10  ;;  %495 = vperm.xlu1 %1010, %v470_v17  }
   0xd   :  { %953 = vmatprep.subr.bf16.mxu0 %v1073_v2 }
   0xf   :  { %105 = vperm.xlu0 %1009, %v67_v19  }
  0x10   :  { %110 = vperm.xlu1 %1010, %v68_v20  }
  0x13   :  { %500 = vperm.xlu0 %1009, %v471_v23  }
  0x14   :  { %956 = vmatpush3.bf16.xpose.msk.msra.mxu0 %vm1127_vm1, %v954_v18  ;;  %505 = vperm.xlu1 %1010, %v472_v24  }
  0x15   :  { %957 = vmatprep.subr.bf16.mxu0 %v1073_v2 }
  0x16   :  { %13 = vsyncpa [#allocation4], 0  ;;  %v55_v28 = vld [vmem:[%s1501_s1 + $0x40] sm:$0xff]  ;;  %v56_v29 = vld [vmem:[%s1501_s1 + $0x48] sm:$0xff]  ;;  %v682_v24 = vlaneseq  ;;  %vm691_vm3 = vcmask 179200   ;;  %vm694_vm4 = vcmask 1045504  }
  0x17   :  { %115 = vperm.xlu0 %1009, %v69_v26   ;;  %v473_v30 = vld [vmem:[%s1504_s4 + $0x20] sm:$0xff]  ;;  %v474_v31 = vld [vmem:[%s1504_s4 + $0x28] sm:$0xff]  ;;  %v962_v32 = vpack.c.bf16 %v56_v29, %v55_v28  ;;  %v57_v35 = vld [vmem:[%s1501_s1 + $0x50] sm:$0xff]  ;;  %s1077_s28 = smov [#allocation3]  }
  0x18   :  { %120 = vperm.xlu1 %1010, %v70_v27   ;;  %v71_v33 = vld [vmem:[%s1503_s3 + $0x40] sm:$0xff]  ;;  %v72_v34 = vld [vmem:[%s1503_s3 + $0x48] sm:$0xff]  ;;  %v58_v36 = vld [vmem:[%s1501_s1 + $0x58] sm:$0xff]  ;;  %s775_s29 = sshll.u32 %s1077_s28, 4  ;;  %s776_s29 = int_to_ptr.vmem [resolvable:$true] %s775_s29 }
  0x19   :  { %v475_v37 = vld [vmem:[%s1504_s4 + $0x30] sm:$0xff]  ;;  %v476_v38 = vld [vmem:[%s1504_s4 + $0x38] sm:$0xff]  ;;  %v966_v39 = vpack.c.bf16 %v58_v36, %v57_v35  ;;  %v59_v42 = vld [vmem:[%s1501_s1 + $0x60] sm:$0xff]  ;;  %s1049_s30 = scalar_lea.vmem %s776_s29, 16  ;;  %s1053_s8 = scalar_lea.vmem %s776_s29, 32 }
  0x1a   :  { %v73_v40 = vld [vmem:[%s1503_s3 + $0x50] sm:$0xff]  ;;  %v74_v41 = vld [vmem:[%s1503_s3 + $0x58] sm:$0xff]  ;;  %v60_v43 = vld [vmem:[%s1501_s1 + $0x68] sm:$0xff]  ;;  %p1050_p0 = scmp.ne.s32.totalorder %s776_s29, %s1049_s30  ;;  %p1054_p1 = scmp.lt.s32.totalorder %s776_s29, %s776_s29 }
  0x1b   :  { %510 = vperm.xlu0 %1009, %v473_v30   ;;  %v477_v44 = vld [vmem:[%s1504_s4 + $0x40] sm:$0xff]  ;;  %v478_v45 = vld [vmem:[%s1504_s4 + $0x48] sm:$0xff]  ;;  %v970_v46 = vpack.c.bf16 %v60_v43, %v59_v42  ;;  %v61_v49 = vld [vmem:[%s1501_s1 + $0x70] sm:$0xff]  ;;  %p1055_p2 = scmp.lt.s32.totalorder %s1053_s8, %s1049_s30 }
  0x1c   :  { %960 = vmatpush3.bf16.xpose.msk.msra.mxu0 %vm1127_vm1, %v958_v25  ;;  %515 = vperm.xlu1 %1010, %v474_v31   ;;  %v75_v47 = vld [vmem:[%s1503_s3 + $0x60] sm:$0xff]  ;;  %v76_v48 = vld [vmem:[%s1503_s3 + $0x68] sm:$0xff]  ;;  %v62_v50 = vld [vmem:[%s1501_s1 + $0x78] sm:$0xff]  ;;  %v683_v25 = vshrl.u32 %v682_v24, 7 }
  0x1d   :  { %961 = vmatprep.subr.bf16.mxu0 %v1073_v2  ;;  %v479_v51 = vld [vmem:[%s1504_s4 + $0x50] sm:$0xff]  ;;  %v480_v52 = vld [vmem:[%s1504_s4 + $0x58] sm:$0xff]  ;;  %v974_v53 = vpack.c.bf16 %v62_v50, %v61_v49  ;;  %v481_v56 = vld [vmem:[%s1504_s4 + $0x60] sm:$0xff]  ;;  %p1056_p3 = por %p1055_p2, %p1054_p1 }
  0x1e   :  { %v77_v54 = vld [vmem:[%s1503_s3 + $0x70] sm:$0xff]  ;;  %v78_v55 = vld [vmem:[%s1503_s3 + $0x78] sm:$0xff]  ;;  %v482_v57 = vld [vmem:[%s1504_s4 + $0x68] sm:$0xff]  ;;  %v688_v26 = vsub.s32 1, %v683_v25  ;;  %v684_v29 = vsub.s32 0, %v683_v25 }
  0x1f   :  { %125 = vperm.xlu0 %1009, %v71_v33   ;;  %v28_v58 = vld [vmem:[%s1502_s2] sm:$0xff]  ;;  %v80_v60 = vld [vmem:[%s1503_s3 + $0x88] sm:$0xff]  ;;  %v483_v62 = vld [vmem:[%s1504_s4 + $0x70] sm:$0xff]  ;;  %p1057_p4 = pnand %p1056_p3, %p1050_p0 }
  0x20   :  { %130 = vperm.xlu1 %1010, %v72_v34   ;;  %v79_v59 = vld [vmem:[%s1503_s3 + $0x80] sm:$0xff]  ;;  %v29_v61 = vld [vmem:[%s1502_s2 + $0x8] sm:$0xff]  ;;  %v484_v63 = vld [vmem:[%s1504_s4 + $0x78] sm:$0xff] }
  0x21   :  { %v30_v0 = vld [vmem:[%s1502_s2 + $0x10] sm:$0xff]  ;;  %v485_v1 = vld [vmem:[%s1504_s4 + $0x80] sm:$0xff]  ;;  %v486_v3 = vld [vmem:[%s1504_s4 + $0x88] sm:$0xff] }
  0x22   :  { %v31_v4 = vld [vmem:[%s1502_s2 + $0x18] sm:$0xff]  ;;  %v81_v6 = vld [vmem:[%s1503_s3 + $0x90] sm:$0x3f]  ;;  %v32_v8 = vld [vmem:[%s1502_s2 + $0x20] sm:$0xff] }
  0x23   :  { %520 = vperm.xlu0 %1009, %v475_v37   ;;  %v487_v7 = vld [vmem:[%s1504_s4 + $0x90] sm:$0x3f]  ;;  %v33_v9 = vld [vmem:[%s1502_s2 + $0x28] sm:$0xff]  ;;  %v35_v11 = vld [vmem:[%s1502_s2 + $0x38] sm:$0xff] }
  0x24   :  { %964 = vmatpush3.bf16.xpose.msk.msra.mxu0 %vm1127_vm1, %v962_v32  ;;  %525 = vperm.xlu1 %1010, %v476_v38   ;;  %v34_v10 = vld [vmem:[%s1502_s2 + $0x30] sm:$0xff]  ;;  %v36_v12 = vld [vmem:[%s1502_s2 + $0x40] sm:$0xff]  ;;  %v37_v13 = vld [vmem:[%s1502_s2 + $0x48] sm:$0xff] }
  0x25   :  { %965 = vmatprep.subr.bf16.mxu0 %v1073_v2  ;;  %v38_v14 = vld [vmem:[%s1502_s2 + $0x50] sm:$0xff]  ;;  %v39_v15 = vld [vmem:[%s1502_s2 + $0x58] sm:$0xff]  ;;  %v40_v16 = vld [vmem:[%s1502_s2 + $0x60] sm:$0xff] }
  0x26   :  { %v41_v17 = vld [vmem:[%s1502_s2 + $0x68] sm:$0xff]  ;;  %v42_v18 = vld [vmem:[%s1502_s2 + $0x70] sm:$0xff]  ;;  %v43_v19 = vld [vmem:[%s1502_s2 + $0x78] sm:$0xff] }
  0x27   :  { %135 = vperm.xlu0 %1009, %v73_v40   ;;  %v44_v20 = vld [vmem:[%s1502_s2 + $0x80] sm:$0xff]  ;;  %v45_v21 = vld [vmem:[%s1502_s2 + $0x88] sm:$0xff]  ;;  %v46_v22 = vld [vmem:[%s1502_s2 + $0x90] sm:$0x3f] }
  0x28   :  { %140 = vperm.xlu1 %1010, %v74_v41   ;;  %v678_v28 = vld [vmem:[%s1505_s5] sm:$0x3] }
  0x29   :  { %v689_v31 = vrot.slane %v678_v28, %v688_v26  ;;  %v1428_v32 = vrot.slane %v678_v28, %v684_v29  ;;  %v1433_v41 = vld [vmem:[%s1500_s0] ss:$0 sm:$0xff] }
  0x2b   :  { %530 = vperm.xlu0 %1009, %v477_v44   ;;  %820 = vmatprep.mubr.msk.f32.mxu1 %vm691_vm3, %v689_v31 }
  0x2c   :  { %968 = vmatpush3.bf16.xpose.msk.msra.mxu0 %vm1127_vm1, %v966_v39  ;;  %535 = vperm.xlu1 %1010, %v478_v45  }
  0x2d   :  { %969 = vmatprep.subr.bf16.mxu0 %v1073_v2 }
  0x2f   :  { %145 = vperm.xlu0 %1009, %v75_v47  }
  0x30   :  { %150 = vperm.xlu1 %1010, %v76_v48  }
  0x33   :  { %540 = vperm.xlu0 %1009, %v479_v51  }
  0x34   :  { %972 = vmatpush3.bf16.xpose.msk.msra.mxu0 %vm1127_vm1, %v970_v46  ;;  %545 = vperm.xlu1 %1010, %v480_v52  }
  0x35   :  { %973 = vmatprep.subr.bf16.mxu0 %v1073_v2 }
  0x37   :  { %155 = vperm.xlu0 %1009, %v77_v54  }
  0x38   :  { %160 = vperm.xlu1 %1010, %v78_v55  }
  0x3b   :  { %550 = vperm.xlu0 %1009, %v481_v56  }
  0x3c   :  { %976 = vmatpush3.bf16.xpose.msk.msra.mxu0 %vm1127_vm1, %v974_v53  ;;  %555 = vperm.xlu1 %1010, %v482_v57  }
  0x3f   :  { %165 = vperm.xlu0 %1009, %v79_v59  }
  0x40   :  { %170 = vperm.xlu1 %1010, %v80_v60  }
  0x43   :  { %889 = vmatmul.mubr.msk.f32.vlgmr.msra.gmra.mrb[0].mxu0 %vm203_vm0, %v28_v58  ;;  %560 = vperm.xlu0 %1009, %v483_v62  }
  0x44   :  { %891 = vmatprep.mubr.msk.f32.mxu0 %vm1074_vm2, %v1075_v5  ;;  %565 = vperm.xlu1 %1010, %v484_v63  }
  0x47   :  { %892 = vmatmul.mubr.msk.f32.gmra.mrb[2].mxu0 %vm203_vm0, %v29_v61  ;;  %570 = vperm.xlu0 %1009, %v485_v1  }
  0x48   :  { %894 = vmatprep.mubr.msk.f32.mxu0 %vm1074_vm2, %v1075_v5  ;;  %575 = vperm.xlu1 %1010, %v486_v3  }
  0x4b   :  { %895 = vmatmul.mubr.msk.f32.gmra.mrb[4].mxu0 %vm203_vm0, %v30_v0  ;;  %175 = vperm.xlu0 %1009, %v81_v6  }
  0x4c   :  { %897 = vmatprep.mubr.msk.f32.mxu0 %vm1074_vm2, %v1075_v5  ;;  %580 = vperm.xlu1 %1010, %v487_v7  }
  0x4f   :  { %898 = vmatmul.mubr.msk.f32.gmra.mrb[6].mxu0 %vm203_vm0, %v31_v4 }
  0x50   :  { %900 = vmatprep.mubr.msk.f32.mxu0 %vm1074_vm2, %v1075_v5 }
  0x53   :  { %901 = vmatmul.mubr.msk.f32.gmra.mrb[8].mxu0 %vm203_vm0, %v32_v8 }
  0x54   :  { %903 = vmatprep.mubr.msk.f32.mxu0 %vm1074_vm2, %v1075_v5 }
  0x57   :  { %904 = vmatmul.mubr.msk.f32.gmra.mrb[10].mxu0 %vm203_vm0, %v33_v9 }
  0x58   :  { %906 = vmatprep.mubr.msk.f32.mxu0 %vm1074_vm2, %v1075_v5 }
  0x5b   :  { %907 = vmatmul.mubr.msk.f32.gmra.mrb[12].mxu0 %vm203_vm0, %v34_v10 }
  0x5c   :  { %909 = vmatprep.mubr.msk.f32.mxu0 %vm1074_vm2, %v1075_v5 }
  0x5f   :  { %910 = vmatmul.mubr.msk.f32.gmra.mrb[14].mxu0 %vm203_vm0, %v35_v11 }
  0x60   :  { %912 = vmatprep.mubr.msk.f32.mxu0 %vm1074_vm2, %v1075_v5 }
  0x63   :  { %913 = vmatmul.mubr.msk.f32.gmra.mrb[16].mxu0 %vm203_vm0, %v36_v12 }
  0x64   :  { %915 = vmatprep.mubr.msk.f32.mxu0 %vm1074_vm2, %v1075_v5 }
  0x67   :  { %916 = vmatmul.mubr.msk.f32.gmra.mrb[18].mxu0 %vm203_vm0, %v37_v13 }
  0x68   :  { %918 = vmatprep.mubr.msk.f32.mxu0 %vm1074_vm2, %v1075_v5 }
  0x6b   :  { %919 = vmatmul.mubr.msk.f32.gmra.mrb[20].mxu0 %vm203_vm0, %v38_v14 }
  0x6c   :  { %921 = vmatprep.mubr.msk.f32.mxu0 %vm1074_vm2, %v1075_v5 }
  0x6f   :  { %922 = vmatmul.mubr.msk.f32.gmra.mrb[22].mxu0 %vm203_vm0, %v39_v15 }
  0x70   :  { %924 = vmatprep.mubr.msk.f32.mxu0 %vm1074_vm2, %v1075_v5 }
  0x73   :  { %925 = vmatmul.mubr.msk.f32.gmra.mrb[24].mxu0 %vm203_vm0, %v40_v16 }
  0x74   :  { %927 = vmatprep.mubr.msk.f32.mxu0 %vm1074_vm2, %v1075_v5 }
  0x77   :  { %928 = vmatmul.mubr.msk.f32.gmra.mrb[26].mxu0 %vm203_vm0, %v41_v17 }
  0x78   :  { %930 = vmatprep.mubr.msk.f32.mxu0 %vm1074_vm2, %v1075_v5 }
  0x7b   :  { %931 = vmatmul.mubr.msk.f32.gmra.mrb[28].mxu0 %vm203_vm0, %v42_v18 }
  0x7c   :  { %933 = vmatprep.mubr.msk.f32.mxu0 %vm1074_vm2, %v1075_v5 }
  0x7f   :  { %934 = vmatmul.mubr.msk.f32.gmra.mrb[30].mxu0 %vm203_vm0, %v43_v19 }
  0x80   :  { %936 = vmatprep.mubr.msk.f32.mxu0 %vm1074_vm2, %v1075_v5 }
  0x82   :  { %v86_v23 = vpop.permute.xlu0 %85 }
  0x83   :  { %937 = vmatmul.mubr.msk.f32.gmra.mrb[32].mxu0 %vm203_vm0, %v44_v20  ;;  %v96_v27 = vpop.permute.xlu1 %95  ;;  %v184_v44 = vmul.f32 %v1433_v41, %v86_v23 }
  0x84   :  { %939 = vmatprep.mubr.msk.f32.mxu0 %vm1074_vm2, %v1075_v5  ;;  %v186_v56 = vmul.f32 %v1433_v41, %v96_v27 }
  0x86   :  { %v91_v30 = vpop.permute.xlu0 %90 }
  0x87   :  { %940 = vmatmul.mubr.msk.f32.gmra.mrb[34].mxu0 %vm203_vm0, %v45_v21  ;;  %v101_v33 = vpop.permute.xlu1 %100  ;;  %v185_v50 = vmul.f32 %v1433_v41, %v91_v30 }
  0x88   :  { %942 = vmatprep.mubr.msk.f32.mxu0 %vm1074_vm2, %v1075_v5  ;;  %v187_v0 = vmul.f32 %v1433_v41, %v101_v33 }
  0x8a   :  { %v491_v34 = vpop.permute.xlu0 %490 }
  0x8b   :  { %943 = vmatmul.mubr.msk.f32.gmra.mrb[36].mxu0 %vm203_vm0, %v46_v22  ;;  %v496_v35 = vpop.permute.xlu1 %495 }
  0x8e   :  { %v106_v36 = vpop.permute.xlu0 %105 }
  0x8f   :  { %v111_v37 = vpop.permute.xlu1 %110  ;;  %v188_v10 = vmul.f32 %v1433_v41, %v106_v36 }
  0x90   :  { %v189_v17 = vmul.f32 %v1433_v41, %v111_v37 }
  0x92   :  { %v501_v38 = vpop.permute.xlu0 %500 }
  0x93   :  { %v506_v39 = vpop.permute.xlu1 %505 }
  0x96   :  { %v116_v40 = vpop.permute.xlu0 %115 }
  0x97   :  { %v1435_v42 = vpop.permute.xlu1 %120  ;;  %v190_v28 = vmul.f32 %v1433_v41, %v116_v40 }
  0x9a   :  { %v511_v43 = vpop.permute.xlu0 %510 }
  0x9b   :  { %v516_v46 = vpop.permute.xlu1 %515 }
  0x9e   :  { %v1438_v49 = vpop.permute.xlu0 %125 }
  0x9f   :  { %v1442_v57 = vpop.permute.xlu1 %130 }
  0xa2   :  { %v521_v59 = vpop.permute.xlu0 %520 }
  0xa3   :  { %v526_v4 = vpop.permute.xlu1 %525 }
  0xa6   :  { %v1445_v9 = vpop.permute.xlu0 %135 }
  0xa7   :  { %v1449_v18 = vpop.permute.xlu1 %140 }
  0xaa   :  { %v531_v20 = vpop.permute.xlu0 %530 }
 0x116   :  { %v375_v45 = vpop.f32.mrb[0].mxu0 }
 0x117   :  { %v376_v47 = vadd.f32 %v375_v45, %v184_v44  ;;  %v890_v48 = vpop.f32.mrb[1].mxu0  ;;  %v191_v44 = vmul.f32 %v1433_v41, %v1435_v42 }
 0x119   :  { %v583_v51 = vadd.f32 %v491_v34, %v376_v47 }
 0x11a   :  { %v380_v52 = vpop.f32.mrb[2].mxu0 }
 0x11b   :  { %v602_v53 = vmul.f32 0.5, %v583_v51  ;;  %v381_v54 = vadd.f32 %v380_v52, %v185_v50  ;;  %v893_v55 = vpop.f32.mrb[3].mxu0 }
 0x11d   :  { %1011 = vtanh.f32 %v602_v53  ;;  %v584_v58 = vadd.f32 %v496_v35, %v381_v54  ;;  %v536_v35 = vpop.permute.xlu1 %535  ;;  %v192_v53 = vmul.f32 %v1433_v41, %v1438_v49 }
 0x11e   :  { %v385_v60 = vpop.f32.mrb[4].mxu0 }
 0x11f   :  { %v603_v61 = vmul.f32 0.5, %v584_v58  ;;  %v386_v62 = vadd.f32 %v385_v60, %v186_v56  ;;  %v896_v63 = vpop.f32.mrb[5].mxu0 }
 0x121   :  { %1013 = vtanh.f32 %v603_v61  ;;  %v585_v1 = vadd.f32 %v501_v38, %v386_v62  ;;  %v1459_v54 = vpop.permute.xlu1 %150 }
 0x122   :  { %v390_v3 = vpop.f32.mrb[6].mxu0 }
 0x123   :  { %v604_v6 = vmul.f32 0.5, %v585_v1  ;;  %v391_v7 = vadd.f32 %v390_v3, %v187_v0  ;;  %v899_v8 = vpop.f32.mrb[7].mxu0  ;;  %v193_v1 = vmul.f32 %v1433_v41, %v1442_v57 }
 0x125   :  { %1015 = vtanh.f32 %v604_v6  ;;  %v586_v11 = vadd.f32 %v506_v39, %v391_v7  ;;  %v1452_v39 = vpop.permute.xlu0 %145  ;;  %v546_v8 = vpop.permute.xlu1 %545 }
 0x126   :  { %v395_v12 = vpop.f32.mrb[8].mxu0 }
 0x127   :  { %v1012_v13 = vpop.eup %1011  ;;  %v605_v14 = vmul.f32 0.5, %v586_v11  ;;  %v396_v15 = vadd.f32 %v395_v12, %v188_v10  ;;  %v902_v16 = vpop.f32.mrb[9].mxu0 }
 0x128   :  { %v640_v22 = vmul.f32 0.5, %v1012_v13 }
 0x129   :  { %1017 = vtanh.f32 %v605_v14  ;;  %v587_v19 = vadd.f32 %v511_v43, %v396_v15  ;;  %v541_v42 = vpop.permute.xlu0 %540  ;;  %v194_v14 = vmul.f32 %v1433_v41, %v1445_v9 }
 0x12a   :  { %v400_v21 = vpop.f32.mrb[10].mxu0  ;;  %v659_v31 = vadd.f32 0.5, %v640_v22 }
 0x12b   :  { %v1014_v23 = vpop.eup %1013  ;;  %v606_v24 = vmul.f32 0.5, %v587_v19  ;;  %v401_v25 = vadd.f32 %v400_v21, %v189_v17  ;;  %v905_v26 = vpop.f32.mrb[11].mxu0 }
 0x12c   :  { %v641_v27 = vmul.f32 0.5, %v1014_v23 }
 0x12d   :  { %1019 = vtanh.f32 %v606_v24  ;;  %v588_v29 = vadd.f32 %v516_v46, %v401_v25  ;;  %v156_v12 = vpop.permute.xlu0 %155  ;;  %v195_v24 = vmul.f32 %v1433_v41, %v1449_v18  ;;  %v161_v25 = vpop.permute.xlu1 %160 }
 0x12e   :  { %v405_v30 = vpop.f32.mrb[12].mxu0  ;;  %v660_v33 = vadd.f32 0.5, %v641_v27 }
 0x12f   :  { %v1016_v34 = vpop.eup %1015  ;;  %v607_v36 = vmul.f32 0.5, %v588_v29  ;;  %v406_v37 = vadd.f32 %v405_v30, %v190_v28  ;;  %v908_v38 = vpop.f32.mrb[13].mxu0 }
 0x130   :  { %v978_v43 = vpack.c.bf16 %v660_v33, %v659_v31  ;;  %v642_v47 = vmul.f32 0.5, %v1016_v34 }
 0x131   :  { %1021 = vtanh.f32 %v607_v36  ;;  %v589_v45 = vadd.f32 %v521_v59, %v406_v37  ;;  %v551_v27 = vpop.permute.xlu0 %550 }
 0x132   :  { %v410_v40 = vpop.f32.mrb[14].mxu0  ;;  %979 = vmatpush1.bf16.msra.mxu1 %v978_v43  ;;  %v661_v58 = vadd.f32 0.5, %v642_v47 }
 0x133   :  { %v1018_v46 = vpop.eup %1017  ;;  %v608_v48 = vmul.f32 0.5, %v589_v45  ;;  %v411_v50 = vadd.f32 %v410_v40, %v191_v44  ;;  %v911_v51 = vpop.f32.mrb[15].mxu0  ;;  %980 = vmatprep.subr.bf16.mxu1 %v1073_v2 }
 0x134   :  { %v643_v52 = vmul.f32 0.5, %v1018_v46  ;;  %v556_v44 = vpop.permute.xlu1 %555 }
 0x135   :  { %1023 = vtanh.f32 %v608_v48  ;;  %v590_v55 = vadd.f32 %v526_v4, %v411_v50  ;;  %v166_v46 = vpop.permute.xlu0 %165  ;;  %v197_v50 = vmul.f32 %v1433_v41, %v1459_v54 }
 0x136   :  { %v415_v56 = vpop.f32.mrb[16].mxu0  ;;  %v662_v59 = vadd.f32 0.5, %v643_v52 }
 0x137   :  { %v1020_v60 = vpop.eup %1019  ;;  %v609_v61 = vmul.f32 0.5, %v590_v55  ;;  %v416_v62 = vadd.f32 %v415_v56, %v192_v53  ;;  %v914_v63 = vpop.f32.mrb[17].mxu0 }
 0x138   :  { %v981_v0 = vpack.c.bf16 %v662_v59, %v661_v58  ;;  %v644_v6 = vmul.f32 0.5, %v1020_v60  ;;  %v198_v59 = vmul.f32 %v1433_v41, %v156_v12  ;;  %v171_v60 = vpop.permute.xlu1 %170 }
 0x139   :  { %1025 = vtanh.f32 %v609_v61  ;;  %v591_v3 = vadd.f32 %v531_v20, %v416_v62  ;;  %v561_v62 = vpop.permute.xlu0 %560 }
 0x13a   :  { %v420_v49 = vpop.f32.mrb[18].mxu0  ;;  %982 = vmatpush1.bf16.msra.mxu1 %v981_v0  ;;  %v663_v16 = vadd.f32 0.5, %v644_v6 }
 0x13b   :  { %v1022_v7 = vpop.eup %1021  ;;  %v610_v4 = vmul.f32 0.5, %v591_v3  ;;  %v421_v10 = vadd.f32 %v420_v49, %v193_v1  ;;  %v917_v11 = vpop.f32.mrb[19].mxu0  ;;  %983 = vmatprep.subr.bf16.mxu1 %v1073_v2 }
 0x13c   :  { %v645_v13 = vmul.f32 0.5, %v1022_v7 }
 0x13d   :  { %1027 = vtanh.f32 %v610_v4  ;;  %v592_v15 = vadd.f32 %v536_v35, %v421_v10  ;;  %v196_v35 = vmul.f32 %v1433_v41, %v1452_v39 }
 0x13e   :  { %v425_v57 = vpop.f32.mrb[20].mxu0  ;;  %v664_v17 = vadd.f32 0.5, %v645_v13  ;;  %v566_v13 = vpop.permute.xlu1 %565 }
 0x13f   :  { %v1024_v19 = vpop.eup %1023  ;;  %v611_v20 = vmul.f32 0.5, %v592_v15  ;;  %v426_v21 = vadd.f32 %v425_v57, %v194_v14  ;;  %v920_v22 = vpop.f32.mrb[21].mxu0 }
 0x140   :  { %v984_v23 = vpack.c.bf16 %v664_v17, %v663_v16  ;;  %v646_v28 = vmul.f32 0.5, %v1024_v19  ;;  %v571_v16 = vpop.permute.xlu0 %570  ;;  %v200_v19 = vmul.f32 %v1433_v41, %v166_v46 }
 0x141   :  { %1029 = vtanh.f32 %v611_v20  ;;  %v593_v26 = vadd.f32 %v541_v42, %v426_v21 }
 0x142   :  { %v430_v29 = vpop.f32.mrb[22].mxu0  ;;  %985 = vmatpush1.bf16.msra.mxu1 %v984_v23  ;;  %v665_v37 = vadd.f32 0.5, %v646_v28 }
 0x143   :  { %v1026_v9 = vpop.eup %1025  ;;  %v612_v30 = vmul.f32 0.5, %v593_v26  ;;  %v431_v31 = vadd.f32 %v430_v29, %v195_v24  ;;  %v923_v33 = vpop.f32.mrb[23].mxu0  ;;  %986 = vmatprep.subr.bf16.mxu1 %v1073_v2  ;;  %v201_v29 = vmul.f32 %v1433_v41, %v171_v60 }
 0x144   :  { %v647_v34 = vmul.f32 0.5, %v1026_v9  ;;  %v576_v9 = vpop.permute.xlu1 %575 }
 0x145   :  { %1031 = vtanh.f32 %v612_v30  ;;  %v594_v36 = vadd.f32 %v546_v8, %v431_v31  ;;  %v199_v8 = vmul.f32 %v1433_v41, %v161_v25  ;;  %v176_v31 = vpop.permute.xlu0 %175 }
 0x146   :  { %v435_v18 = vpop.f32.mrb[24].mxu0  ;;  %v666_v38 = vadd.f32 0.5, %v647_v34 }
 0x147   :  { %v1028_v43 = vpop.eup %1027  ;;  %v613_v45 = vmul.f32 0.5, %v594_v36  ;;  %v436_v47 = vadd.f32 %v435_v18, %v196_v35  ;;  %v926_v40 = vpop.f32.mrb[25].mxu0 }
 0x148   :  { %v987_v48 = vpack.c.bf16 %v666_v38, %v665_v37  ;;  %v648_v52 = vmul.f32 0.5, %v1028_v43  ;;  %v202_v43 = vmul.f32 %v1433_v41, %v176_v31 }
 0x149   :  { %1033 = vtanh.f32 %v613_v45  ;;  %v595_v51 = vadd.f32 %v551_v27, %v436_v47 }
 0x14a   :  { %v440_v53 = vpop.f32.mrb[26].mxu0  ;;  %988 = vmatpush1.bf16.msra.mxu1 %v987_v48  ;;  %v667_v54 = vadd.f32 0.5, %v648_v52  ;;  %v581_v52 = vpop.permute.xlu1 %580 }
 0x14b   :  { %v1030_v39 = vpop.eup %1029  ;;  %v614_v55 = vmul.f32 0.5, %v595_v51  ;;  %v441_v42 = vadd.f32 %v440_v53, %v197_v50  ;;  %v929_v56 = vpop.f32.mrb[27].mxu0  ;;  %989 = vmatprep.subr.bf16.mxu1 %v1073_v2 }
 0x14c   :  { %v649_v58 = vmul.f32 0.5, %v1030_v39 }
 0x14d   :  { %1035 = vtanh.f32 %v614_v55  ;;  %v596_v61 = vadd.f32 %v556_v44, %v441_v42 }
 0x14e   :  { %v445_v63 = vpop.f32.mrb[28].mxu0  ;;  %v668_v0 = vadd.f32 0.5, %v649_v58 }
 0x14f   :  { %v1032_v1 = vpop.eup %1031  ;;  %v615_v3 = vmul.f32 0.5, %v596_v61  ;;  %v446_v6 = vadd.f32 %v445_v63, %v198_v59  ;;  %v932_v49 = vpop.f32.mrb[29].mxu0 }
 0x150   :  { %v990_v7 = vpack.c.bf16 %v668_v0, %v667_v54  ;;  %v650_v10 = vmul.f32 0.5, %v1032_v1 }
 0x151   :  { %1037 = vtanh.f32 %v615_v3  ;;  %v597_v4 = vadd.f32 %v561_v62, %v446_v6 }
 0x152   :  { %v450_v11 = vpop.f32.mrb[30].mxu0  ;;  %991 = vmatpush1.bf16.msra.mxu1 %v990_v7  ;;  %v669_v22 = vadd.f32 0.5, %v650_v10 }
 0x153   :  { %v1034_v12 = vpop.eup %1033  ;;  %v616_v14 = vmul.f32 0.5, %v597_v4  ;;  %v451_v15 = vadd.f32 %v450_v11, %v199_v8  ;;  %v935_v57 = vpop.f32.mrb[31].mxu0  ;;  %992 = vmatprep.subr.bf16.mxu1 %v1073_v2  ;;  %v680_v8 = vstv %s1506_s6 }
 0x154   :  { %v651_v17 = vmul.f32 0.5, %v1034_v12 }
 0x155   :  { %1039 = vtanh.f32 %v616_v14  ;;  %v598_v20 = vadd.f32 %v566_v13, %v451_v15 }
 0x156   :  { %v455_v21 = vpop.f32.mrb[32].mxu0  ;;  %v670_v23 = vadd.f32 0.5, %v651_v17 }
 0x157   :  { %v1036_v24 = vpop.eup %1035  ;;  %v617_v25 = vmul.f32 0.5, %v598_v20  ;;  %v456_v26 = vadd.f32 %v455_v21, %v200_v19  ;;  %v938_v27 = vpop.f32.mrb[33].mxu0 }
 0x158   :  { %v993_v28 = vpack.c.bf16 %v670_v23, %v669_v22  ;;  %v652_v33 = vmul.f32 0.5, %v1036_v24 }
 0x159   :  { %1041 = vtanh.f32 %v617_v25  ;;  %v599_v30 = vadd.f32 %v571_v16, %v456_v26 }
 0x15a   :  { %v460_v34 = vpop.f32.mrb[34].mxu0  ;;  %994 = vmatpush1.bf16.msra.mxu1 %v993_v28  ;;  %v671_v47 = vadd.f32 0.5, %v652_v33 }
 0x15b   :  { %v1038_v35 = vpop.eup %1037  ;;  %v618_v36 = vmul.f32 0.5, %v599_v30  ;;  %v461_v18 = vadd.f32 %v460_v34, %v201_v29  ;;  %v941_v37 = vpop.f32.mrb[35].mxu0  ;;  %995 = vmatprep.subr.bf16.mxu1 %v1073_v2 }
 0x15c   :  { %v653_v38 = vmul.f32 0.5, %v1038_v35 }
 0x15d   :  { %1043 = vtanh.f32 %v618_v36  ;;  %v600_v44 = vadd.f32 %v576_v9, %v461_v18 }
 0x15e   :  { %v465_v45 = vpop.f32.mrb[36].mxu0  ;;  %v672_v40 = vadd.f32 0.5, %v653_v38 }
 0x15f   :  { %v1040_v46 = vpop.eup %1039  ;;  %v619_v48 = vmul.f32 0.5, %v600_v44  ;;  %v466_v50 = vadd.f32 %v465_v45, %v202_v43  ;;  %v944_v51 = vpop.f32.mrb[37].mxu0 }
 0x160   :  { %v996_v53 = vpack.c.bf16 %v672_v40, %v671_v47  ;;  %v654_v55 = vmul.f32 0.5, %v1040_v46 }
 0x161   :  { %1045 = vtanh.f32 %v619_v48  ;;  %v601_v39 = vadd.f32 %v581_v52, %v466_v50 }
 0x162   :  { %997 = vmatpush1.bf16.msra.mxu1 %v996_v53  ;;  %v673_v58 = vadd.f32 0.5, %v654_v55 }
 0x163   :  { %v1042_v42 = vpop.eup %1041  ;;  %v620_v56 = vmul.f32 0.5, %v601_v39  ;;  %998 = vmatprep.subr.bf16.mxu1 %v1073_v2 }
 0x164   :  { %v655_v41 = vmul.f32 0.5, %v1042_v42 }
 0x165   :  { %1047 = vtanh.f32 %v620_v56 }
 0x166   :  { %v674_v59 = vadd.f32 0.5, %v655_v41 }
 0x167   :  { %v1044_v60 = vpop.eup %1043 }
 0x168   :  { %v999_v61 = vpack.c.bf16 %v674_v59, %v673_v58  ;;  %v656_v62 = vmul.f32 0.5, %v1044_v60 }
 0x16a   :  { %1000 = vmatpush1.bf16.msra.mxu1 %v999_v61  ;;  %v675_v0 = vadd.f32 0.5, %v656_v62 }
 0x16b   :  { %v1046_v63 = vpop.eup %1045  ;;  %1001 = vmatprep.subr.bf16.mxu1 %v1073_v2 }
 0x16c   :  { %v657_v54 = vmul.f32 0.5, %v1046_v63 }
 0x16e   :  { %v676_v1 = vadd.f32 0.5, %v657_v54 }
 0x16f   :  { %v1048_v3 = vpop.eup %1047 }
 0x170   :  { %v658_v6 = vmul.f32 0.5, %v1048_v3  ;;  %v1002_v49 = vpack.c.bf16 %v676_v1, %v675_v0 }
 0x172   :  { %1003 = vmatpush1.bf16.msra.mxu1 %v1002_v49  ;;  %v677_v7 = vadd.f32 0.5, %v658_v6 }
 0x173   :  { %734 = vmatprep.subr.mxu1 %v1075_v5 }
 0x176   :  { %819 = vmatpush1.msk.msra.mxu1 %vm694_vm4, %v677_v7 }
 0x177   :  { %763 = vmatmul.mubr.f32.vlgmr.msra.gmra.mrb[0].mxu1 %v1428_v32 }
 0x24a   :  { %v764_v2 = vpop.f32.mrb[0].mxu1 }
 0x24b   :  { %v765_v4 = vadd.f32 %v764_v2, %v680_v8  ;;  %v766_v10 = vpop.f32.mrb[1].mxu1 }
 0x24d   :  { %768 = vst [vmem:[#allocation3] sm:$0x1] %v765_v4 }
 0x24e   :  { %1060 = shalt.err (!%p1057_p4)
}
 0x24f   :  { %s1061_s11 = scalar_lea.hbm %s1507_s7, 16 }
 0x250   :  { %p1062_p5 = scmp.ne.s32.totalorder %s1507_s7, %s1061_s11  ;;  %p1065_p6 = scmp.lt.u32.totalorder %s1061_s11, %s1507_s7 }
 0x252   :  { %p1067_p7 = pnand %p1065_p6, %p1062_p5 }
 0x254   :  { %1070 = shalt.err (!%p1067_p7)
}
 0x255   :  { %778 = dma.vmem_to_hbm [thread:$0]  %s776_s29, 16, %s1507_s7, [#allocation4]  }
 0x256   :  { %1071 = dma.done.wait [#allocation4], 16  }
 0x257   :  { %1072 = vsyncadd [#allocation4], 4294967280 }
 0x258   :  { %782 = vsyncpa [#allocation4], 1 }

</bundles_post_ra>
